<compile_context>
chip_gen: v6e
topology: v6e:2x2x1
jax: 0.10.0
libtpu: 0.0.40
codegen_flags: <defaults>
</compile_context>

<pallas_src>
import functools

import jax
import jax.numpy as jnp
from jax.experimental import pallas as pl
from jax.experimental.pallas import tpu as pltpu

H1_RAW, H2_RAW = 400, 300   # PyTorch module's hidden sizes
LANE = 128
SUBLANE = 8
H1_PAD = 512                # round_up(400, 128)
H2_PAD = 384                # round_up(300, 128); do NOT round further to 512
TB_MAX = 1024               # batch tile for throughput-sized batches


def _round_up(x, m):
    return (x + m - 1) // m * m


def _bf16_epilogue_supported():
    """bf16 VALU exists on v6e/v7x; keep the f32 elementwise path on v5e/older."""
    try:
        kind = jax.devices()[0].device_kind.lower()
    except Exception:
        return False
    return not any(tag in kind for tag in ("v2", "v3", "v4", "v5"))


def actor_kernel(x_ref, w1_ref, b1_ref, w2_ref, b2_ref, w3_ref, b3_ref, o_ref,
                 *, bf16_epilogue: bool):
    # x arrives f32 at its true feature width; cast to bf16 on the VMEM tile.
    # The MXU pads the small K internally at zero HBM/DMA cost.
    x = x_ref[...].astype(jnp.bfloat16)                                         # (TB, IN)

    h1 = jnp.dot(x, w1_ref[...], preferred_element_type=jnp.float32) + b1_ref[...]
    if bf16_epilogue:   # cast-then-max == max-then-cast for max(x, 0)
        h1 = jnp.maximum(h1.astype(jnp.bfloat16), jnp.bfloat16(0.0))            # (TB, 512)
    else:
        h1 = jnp.maximum(h1, 0.0).astype(jnp.bfloat16)

    h2 = jnp.dot(h1, w2_ref[...], preferred_element_type=jnp.float32) + b2_ref[...]
    if bf16_epilogue:
        h2 = jnp.maximum(h2.astype(jnp.bfloat16), jnp.bfloat16(0.0))            # (TB, 384)
    else:
        h2 = jnp.maximum(h2, 0.0).astype(jnp.bfloat16)

    h3 = jnp.dot(h2, w3_ref[...], preferred_element_type=jnp.float32) + b3_ref[...]
    o_ref[...] = jnp.tanh(h3).astype(o_ref.dtype)                               # (TB, OUT)


def init_actor_params(key, input_dim, output_dim):
    """PyTorch-default-style Linear init (uniform +-1/sqrt(fan_in)).
    Returns *unpadded* f32 params, weights stored (in_features, out_features)."""
    dims = [(input_dim, H1_RAW), (H1_RAW, H2_RAW), (H2_RAW, output_dim)]
    params = {}
    for i, (fan_in, fan_out) in enumerate(dims, start=1):
        key, kw, kb = jax.random.split(key, 3)
        bound = 1.0 / jnp.sqrt(float(fan_in))
        params[f"w{i}"] = jax.random.uniform(
            kw, (fan_in, fan_out), jnp.float32, minval=-bound, maxval=bound)
        params[f"b{i}"] = jax.random.uniform(
            kb, (1, fan_out), jnp.float32, minval=-bound, maxval=bound)
    return params


def prepare_actor_params(params):
    """Zero-pad only the *hidden* dims to multiples of 128 and cast weights to bf16.
    Input / output feature dims stay at their true width. Do once; reuse."""
    input_dim = params["w1"].shape[0]
    output_dim = params["w3"].shape[1]

    def pad2(a, rows, cols):
        return jnp.pad(a, ((0, rows - a.shape[0]), (0, cols - a.shape[1])))

    return {
        "w1": pad2(params["w1"], input_dim, H1_PAD).astype(jnp.bfloat16),   # (IN, 512)
        "b1": pad2(params["b1"], 1, H1_PAD).astype(jnp.float32),            # (1, 512)
        "w2": pad2(params["w2"], H1_PAD, H2_PAD).astype(jnp.bfloat16),      # (512, 384)
        "b2": pad2(params["b2"], 1, H2_PAD).astype(jnp.float32),            # (1, 384)
        "w3": pad2(params["w3"], H2_PAD, output_dim).astype(jnp.bfloat16),  # (384, OUT)
        "b3": params["b3"].astype(jnp.float32),                             # (1, OUT)
    }


def actor_forward(x, prepped, *, tb=None):
    """x: (B, input_dim) f32. prepped: output of prepare_actor_params.
    Returns (B, output_dim) f32."""
    B, input_dim = x.shape
    assert prepped["w1"].shape[0] == input_dim
    h1 = prepped["w1"].shape[1]
    h2 = prepped["w2"].shape[1]
    output_dim = prepped["w3"].shape[1]

    # Batch tiling (see header comment).
    if tb is not None:
        TB = tb
        B_pad = _round_up(B, TB)
    elif B <= TB_MAX:
        TB = B // 2 if (B >= 16 and B % 16 == 0) else B   # 2 steps -> both v7x TCs
        B_pad = B
    else:
        TB = TB_MAX
        B_pad = _round_up(B, TB)

    x_in = x if B_pad == B else jnp.pad(x, ((0, B_pad - B), (0, 0)))
    grid = (B_pad // TB,)

    flops = 2 * B_pad * (input_dim * h1 + h1 * h2 + h2 * output_dim)
    bytes_accessed = (
        int(x_in.size) * x_in.dtype.itemsize
        + sum(int(v.size) * v.dtype.itemsize for v in prepped.values())
        + B_pad * output_dim * 4
    )

    kernel = functools.partial(actor_kernel,
                               bf16_epilogue=_bf16_epilogue_supported())

    out = pl.pallas_call(
        kernel,
        out_shape=jax.ShapeDtypeStruct((B_pad, output_dim), jnp.float32),
        grid_spec=pltpu.PrefetchScalarGridSpec(
            num_scalar_prefetch=0,
            grid=grid,
            in_specs=[
                pl.BlockSpec((TB, input_dim), lambda i: (i, 0)),   # x tile, true width
                pl.BlockSpec((input_dim, h1), lambda i: (0, 0)),   # weights/biases:
                pl.BlockSpec((1, h1), lambda i: (0, 0)),           #   constant block index
                pl.BlockSpec((h1, h2), lambda i: (0, 0)),          #   -> VMEM-resident,
                pl.BlockSpec((1, h2), lambda i: (0, 0)),           #   no per-step re-DMA
                pl.BlockSpec((h2, output_dim), lambda i: (0, 0)),
                pl.BlockSpec((1, output_dim), lambda i: (0, 0)),
            ],
            out_specs=pl.BlockSpec((TB, output_dim), lambda i: (i, 0)),  # true width
        ),
        compiler_params=pltpu.CompilerParams(
            dimension_semantics=("parallel",),   # shard batch tiles across v7x's 2 TCs
        ),
        cost_estimate=pl.CostEstimate(
            flops=flops,
            transcendentals=B_pad * output_dim,
            bytes_accessed=bytes_accessed,
        ),
    )(x_in, prepped["w1"], prepped["b1"], prepped["w2"], prepped["b2"],
      prepped["w3"], prepped["b3"])

    return out if B_pad == B else out[:B]


def actor_ref(x, params):
    """Pure-JAX f32 reference (unpadded params) for correctness check."""
    h = jnp.maximum(x @ params["w1"] + params["b1"], 0.0)
    h = jnp.maximum(h @ params["w2"] + params["b2"], 0.0)
    return jnp.tanh(h @ params["w3"] + params["b3"])


if __name__ == "__main__":
    input_dim = 16
    output_dim = 8

    key = jax.random.PRNGKey(0)
    key, kx = jax.random.split(key)
    params = init_actor_params(key, input_dim, output_dim)
    prepped = prepare_actor_params(params)

    # Latency-shaped batch (RL actor): single tile, zero wrapper pad/cast/slice ops.
    x_small = jax.random.normal(kx, (2, input_dim), dtype=jnp.float32)
    out_small = jax.block_until_ready(actor_forward(x_small, prepped))
    ref_small = actor_ref(x_small, params)
    assert out_small.shape == (2, output_dim)
    # bf16 matmul inputs / activations -> relaxed tolerance vs. the f32 reference.
    assert jnp.allclose(out_small, ref_small, atol=2e-2, rtol=2e-2), "mismatch (B=2)"

    # Multi-tile path (two grid steps -> exercises pipelining / both v7x TCs).
    key, kx2 = jax.random.split(key)
    x_big = jax.random.normal(kx2, (96, input_dim), dtype=jnp.float32)
    out_big = jax.block_until_ready(actor_forward(x_big, prepped))
    ref_big = actor_ref(x_big, params)
    assert out_big.shape == (96, output_dim)
    assert jnp.allclose(out_big, ref_big, atol=2e-2, rtol=2e-2), "mismatch (B=96)"

    print("KERNEL_OK")
</pallas_src>

<mosaic_0001>
module attributes {stable_mosaic.version = 11 : i64} {
  func.func @actor_kernel(%arg0: i32, %arg1: memref<2x16xf32, #tpu.memory_space<vmem>>, %arg2: memref<16x512xbf16, #tpu.memory_space<vmem>>, %arg3: memref<1x512xf32, #tpu.memory_space<vmem>>, %arg4: memref<512x384xbf16, #tpu.memory_space<vmem>>, %arg5: memref<1x384xf32, #tpu.memory_space<vmem>>, %arg6: memref<384x8xbf16, #tpu.memory_space<vmem>>, %arg7: memref<1x8xf32, #tpu.memory_space<vmem>>, %arg8: memref<2x8xf32, #tpu.memory_space<vmem>>) attributes {dimension_semantics = [#tpu.dimension_semantics<parallel>], iteration_bounds = array<i64: 1>, scalar_prefetch = 0 : i64, scratch_operands = 0 : i64, tpu.core_type = #tpu.core_type<tc>, window_params = [{transform_indices = @transform_0, window_bounds = array<i64: 2, 16>}, {pipeline_mode = #tpu.pipeline_mode<synchronous>, transform_indices = @transform_1, window_bounds = array<i64: 16, 512>}, {pipeline_mode = #tpu.pipeline_mode<synchronous>, transform_indices = @transform_2, window_bounds = array<i64: 1, 512>}, {pipeline_mode = #tpu.pipeline_mode<synchronous>, transform_indices = @transform_3, window_bounds = array<i64: 512, 384>}, {pipeline_mode = #tpu.pipeline_mode<synchronous>, transform_indices = @transform_4, window_bounds = array<i64: 1, 384>}, {pipeline_mode = #tpu.pipeline_mode<synchronous>, transform_indices = @transform_5, window_bounds = array<i64: 384, 8>}, {pipeline_mode = #tpu.pipeline_mode<synchronous>, transform_indices = @transform_6, window_bounds = array<i64: 1, 8>}, {transform_indices = @transform_7, window_bounds = array<i64: 2, 8>}]} {
    %c0 = arith.constant 0 : index
    %c0_0 = arith.constant 0 : index
    %0 = vector.load %arg1[%c0, %c0_0] : memref<2x16xf32, #tpu.memory_space<vmem>>, vector<2x16xf32>
    %1 = arith.truncf %0 : vector<2x16xf32> to vector<2x16xbf16>
    %c0_1 = arith.constant 0 : index
    %c0_2 = arith.constant 0 : index
    %2 = vector.load %arg2[%c0_1, %c0_2] : memref<16x512xbf16, #tpu.memory_space<vmem>>, vector<16x512xbf16>
    %cst = arith.constant dense<0.000000e+00> : vector<2x512xf32>
    %3 = tpu.matmul %1, %2, %cst {dimension_numbers = #tpu.dot_dimension_numbers<[1], [0], [0], [1], [0, 0, 1, 1], [], []>} : vector<2x16xbf16>, vector<16x512xbf16>, vector<2x512xf32> -> vector<2x512xf32>
    %c0_3 = arith.constant 0 : index
    %c0_4 = arith.constant 0 : index
    %4 = vector.load %arg3[%c0_3, %c0_4] : memref<1x512xf32, #tpu.memory_space<vmem>>, vector<1x512xf32>
    %5 = vector.broadcast %4 : vector<1x512xf32> to vector<2x512xf32>
    %6 = arith.addf %3, %5 : vector<2x512xf32>
    %7 = arith.truncf %6 : vector<2x512xf32> to vector<2x512xbf16>
    %cst_5 = arith.constant 0.000000e+00 : bf16
    %8 = vector.broadcast %cst_5 : bf16 to vector<2x512xbf16>
    %9 = arith.maximumf %7, %8 : vector<2x512xbf16>
    %c0_6 = arith.constant 0 : index
    %c0_7 = arith.constant 0 : index
    %10 = vector.load %arg4[%c0_6, %c0_7] : memref<512x384xbf16, #tpu.memory_space<vmem>>, vector<512x384xbf16>
    %cst_8 = arith.constant dense<0.000000e+00> : vector<2x384xf32>
    %11 = tpu.matmul %9, %10, %cst_8 {dimension_numbers = #tpu.dot_dimension_numbers<[1], [0], [0], [1], [0, 0, 1, 1], [], []>} : vector<2x512xbf16>, vector<512x384xbf16>, vector<2x384xf32> -> vector<2x384xf32>
    %c0_9 = arith.constant 0 : index
    %c0_10 = arith.constant 0 : index
    %12 = vector.load %arg5[%c0_9, %c0_10] : memref<1x384xf32, #tpu.memory_space<vmem>>, vector<1x384xf32>
    %13 = vector.broadcast %12 : vector<1x384xf32> to vector<2x384xf32>
    %14 = arith.addf %11, %13 : vector<2x384xf32>
    %15 = arith.truncf %14 : vector<2x384xf32> to vector<2x384xbf16>
    %cst_11 = arith.constant 0.000000e+00 : bf16
    %16 = vector.broadcast %cst_11 : bf16 to vector<2x384xbf16>
    %17 = arith.maximumf %15, %16 : vector<2x384xbf16>
    %c0_12 = arith.constant 0 : index
    %c0_13 = arith.constant 0 : index
    %18 = vector.load %arg6[%c0_12, %c0_13] : memref<384x8xbf16, #tpu.memory_space<vmem>>, vector<384x8xbf16>
    %cst_14 = arith.constant dense<0.000000e+00> : vector<2x8xf32>
    %19 = tpu.matmul %17, %18, %cst_14 {dimension_numbers = #tpu.dot_dimension_numbers<[1], [0], [0], [1], [0, 0, 1, 1], [], []>} : vector<2x384xbf16>, vector<384x8xbf16>, vector<2x8xf32> -> vector<2x8xf32>
    %c0_15 = arith.constant 0 : index
    %c0_16 = arith.constant 0 : index
    %20 = vector.load %arg7[%c0_15, %c0_16] : memref<1x8xf32, #tpu.memory_space<vmem>>, vector<1x8xf32>
    %21 = vector.broadcast %20 : vector<1x8xf32> to vector<2x8xf32>
    %22 = arith.addf %19, %21 : vector<2x8xf32>
    %23 = math.tanh %22 : vector<2x8xf32>
    %c0_17 = arith.constant 0 : index
    %c0_18 = arith.constant 0 : index
    %24 = vector.load %arg8[%c0_17, %c0_18] : memref<2x8xf32, #tpu.memory_space<vmem>>, vector<2x8xf32>
    tpu.vector_store %arg8[%c0_17, %c0_18], %23 {strides = array<i32>} : memref<2x8xf32, #tpu.memory_space<vmem>>, vector<2x8xf32>,
    return
  }
  func.func @transform_0(%arg0: i32) -> (i32, i32) {
    %c0_i32 = arith.constant 0 : i32
    %c0_i32_0 = arith.constant 0 : i32
    return %arg0, %c0_i32 : i32, i32
  }
  func.func @transform_1(%arg0: i32) -> (i32, i32) {
    %c0_i32 = arith.constant 0 : i32
    %c0_i32_0 = arith.constant 0 : i32
    %c0_i32_1 = arith.constant 0 : i32
    return %c0_i32, %c0_i32_0 : i32, i32
  }
  func.func @transform_2(%arg0: i32) -> (i32, i32) {
    %c0_i32 = arith.constant 0 : i32
    %c0_i32_0 = arith.constant 0 : i32
    %c0_i32_1 = arith.constant 0 : i32
    return %c0_i32, %c0_i32_0 : i32, i32
  }
  func.func @transform_3(%arg0: i32) -> (i32, i32) {
    %c0_i32 = arith.constant 0 : i32
    %c0_i32_0 = arith.constant 0 : i32
    %c0_i32_1 = arith.constant 0 : i32
    return %c0_i32, %c0_i32_0 : i32, i32
  }
  func.func @transform_4(%arg0: i32) -> (i32, i32) {
    %c0_i32 = arith.constant 0 : i32
    %c0_i32_0 = arith.constant 0 : i32
    %c0_i32_1 = arith.constant 0 : i32
    return %c0_i32, %c0_i32_0 : i32, i32
  }
  func.func @transform_5(%arg0: i32) -> (i32, i32) {
    %c0_i32 = arith.constant 0 : i32
    %c0_i32_0 = arith.constant 0 : i32
    %c0_i32_1 = arith.constant 0 : i32
    return %c0_i32, %c0_i32_0 : i32, i32
  }
  func.func @transform_6(%arg0: i32) -> (i32, i32) {
    %c0_i32 = arith.constant 0 : i32
    %c0_i32_0 = arith.constant 0 : i32
    %c0_i32_1 = arith.constant 0 : i32
    return %c0_i32, %c0_i32_0 : i32, i32
  }
  func.func @transform_7(%arg0: i32) -> (i32, i32) {
    %c0_i32 = arith.constant 0 : i32
    %c0_i32_0 = arith.constant 0 : i32
    return %arg0, %c0_i32 : i32, i32
  }
}

</mosaic_0001>

<bundles_post_ra>
// kernel: tpu_custom_call.1
= control target key start
LH: loop header
LB: loop body
LE: loop exit
PB: predicated region body
PF: predicated region fallthrough
CT: control target
= control target key end

     0   :  { %12 = vsyncpa [#allocation3], 0  ;;  %s1923_s0 = inlined_call_operand.vmem [shape: f32[2,16], index: 0, kind: input, shape index: {}]   ;;  %s1924_s1 = inlined_call_operand.vmem [shape: bf16[16,512], index: 1, kind: input, shape index: {}]   ;;  %s1925_s2 = inlined_call_operand.vmem [shape: f32[1,512], index: 2, kind: input, shape index: {}]   ;;  %s1926_s3 = inlined_call_operand.hbm [shape: bf16[512,384], index: 3, kind: input, shape index: {}]   ;;  %s1927_s4 = inlined_call_operand.vmem [shape: f32[1,384], index: 4, kind: input, shape index: {}]   ;;  %s1928_s5 = inlined_call_operand.vmem [shape: bf16[384,8], index: 5, kind: input, shape index: {}]   ;;  %s1929_s6 = inlined_call_operand.vmem [shape: f32[1,8], index: 6, kind: input, shape index: {}]   ;;  %s1930_s7 = inlined_call_operand.hbm [shape: f32[2,8], index: 7, kind: output, shape index: {}]  }
   0x1   :  { %13 = vsyncpa [#allocation4], 0  ;;  %s1739_s24 = smov [#allocation2]  }
   0x2   :  { %s25_s25 = sshll.u32 %s1739_s24, 4  ;;  %s26_s25 = int_to_ptr.vmem [resolvable:$true] %s25_s25 }
   0x3   :  { %s1703_s26 = scalar_lea.vmem %s26_s25, 12288  ;;  %p1708_p1 = scmp.lt.s32.totalorder %s26_s25, %s26_s25 }
   0x4   :  { %p1704_p0 = scmp.ne.s32.totalorder %s26_s25, %s1703_s26  ;;  %p1709_p2 = scmp.lt.s32.totalorder %s1703_s26, %s1703_s26 }
   0x6   :  { %p1710_p3 = por %p1709_p2, %p1708_p1 }
   0x8   :  { %p1711_p4 = pnand %p1710_p3, %p1704_p0 }
   0xa   :  { %1714 = shalt.err (!%p1711_p4)
}
   0xb   :  { %s1740_s27 = smov 192   ;;  %s1741_s28 = smov 12  }
   0xc   :  { %31 = dma.hbm_to_vmem [thread:$0]  %s1926_s3, 12288, %s26_s25, [#allocation3], %s1740_s27, %s1740_s27, %s1741_s28  }
   0xd   :  { %1735 = dma.done.wait [#allocation3], 12288  }
   0xe   :  { %1736 = vsyncadd [#allocation3], 4294955008  ;;  %v1742_v0 = vmov 0   ;;  %v1535_v1 = vld [vmem:[%s1924_s1 + $0x4] ss:$16 sps:$4 sm:$0xff]   ;;  %vm90_vm0 = vcmask 130048  }
   0xf   :  { %126 = vmatprep.mubr.bf16.mxu0 %v1742_v0  ;;  %167 = vmatprep.mubr.bf16.mxu1 %v1742_v0  ;;  %v1537_v2 = vld [vmem:[%s1924_s1 + $0xc] ss:$16 sps:$4 sm:$0xff]   ;;  %v1539_v3 = vld [vmem:[%s1924_s1] ss:$16 sps:$4 sm:$0xff]   ;;  %v1540_v4 = vld [vmem:[%s1924_s1 + $0x8] ss:$16 sps:$4 sm:$0xff]  }
  0x10   :  { %108 = vmatprep.subr.bf16.mxu0 %v1535_v1  ;;  %v42_v5 = vld [vmem:[%s1923_s0] sm:$0x3]  ;;  %149 = vmatprep.subr.bf16.mxu1 %v1537_v2  ;;  %v1541_v7 = vld [vmem:[#allocation2 + $0xa8] ss:$12 sps:$4 sm:$0xff]   ;;  %v1543_v8 = vld [vmem:[#allocation2 + $0xac] ss:$12 sps:$4 sm:$0xff]  }
  0x11   :  { %v43_v6 = vpack.c.bf16 %v42_v5, %v42_v5  ;;  %109 = vmatpush1.bf16.msra.mxu0 %v1539_v3  ;;  %150 = vmatpush1.bf16.msra.mxu1 %v1540_v4  ;;  %v1544_v9 = vld [vmem:[#allocation2 + $0x228] ss:$12 sps:$4 sm:$0xff]   ;;  %v1546_v10 = vld [vmem:[#allocation2 + $0x22c] ss:$12 sps:$4 sm:$0xff]   ;;  %v1547_v12 = vld [vmem:[#allocation2 + $0x90] ss:$12 sps:$4 sm:$0xff]  }
  0x12   :  { %841 = vmatprep.subr.bf16.mxu0 %v1543_v8  ;;  %v1549_v11 = vld [vmem:[#allocation2 + $0x94] ss:$12 sps:$4 sm:$0xff]   ;;  %882 = vmatprep.subr.bf16.mxu1 %v1546_v10  ;;  %v1550_v14 = vld [vmem:[#allocation2 + $0x210] ss:$12 sps:$4 sm:$0xff]   ;;  %v1553_v17 = vld [vmem:[#allocation2 + $0x78] ss:$12 sps:$4 sm:$0xff]   ;;  %v50_v10 = vlaneseq }
  0x13   :  { %v1552_v13 = vld [vmem:[#allocation2 + $0x214] ss:$12 sps:$4 sm:$0xff]   ;;  %v1555_v15 = vld [vmem:[#allocation2 + $0x7c] ss:$12 sps:$4 sm:$0xff]   ;;  %v1556_v18 = vld [vmem:[#allocation2 + $0x1f8] ss:$12 sps:$4 sm:$0xff]  }
  0x14   :  { %1310 = vmatmul.mubr.msk.bf16.vlgmr.msra.gmra.mxu0 %vm90_vm0, %v43_v6  ;;  %1311 = vmatmul.mubr.msk.bf16.vlgmr.msra.gmra.mxu1 %vm90_vm0, %v43_v6  ;;  %v1558_v16 = vld [vmem:[#allocation2 + $0x1fc] ss:$12 sps:$4 sm:$0xff]   ;;  %v1561_v19 = vld [vmem:[#allocation2 + $0x64] ss:$12 sps:$4 sm:$0xff]   ;;  %v1559_v21 = vld [vmem:[#allocation2 + $0x60] ss:$12 sps:$4 sm:$0xff]  }
  0x15   :  { %842 = vmatpush1.bf16.msra.mxu0 %v1541_v7  ;;  %883 = vmatpush1.bf16.msra.mxu1 %v1544_v9  ;;  %v1564_v20 = vld [vmem:[#allocation2 + $0x1e4] ss:$12 sps:$4 sm:$0xff]   ;;  %v1562_v22 = vld [vmem:[#allocation2 + $0x1e0] ss:$12 sps:$4 sm:$0xff]   ;;  %v1565_v25 = vld [vmem:[#allocation2 + $0x48] ss:$12 sps:$4 sm:$0xff]  }
  0x16   :  { %843 = vmatprep.subr.bf16.mxu0 %v1549_v11  ;;  %884 = vmatprep.subr.bf16.mxu1 %v1552_v13  ;;  %v1567_v23 = vld [vmem:[#allocation2 + $0x4c] ss:$12 sps:$4 sm:$0xff]   ;;  %v1568_v26 = vld [vmem:[#allocation2 + $0x1c8] ss:$12 sps:$4 sm:$0xff]   ;;  %v1571_v29 = vld [vmem:[#allocation2 + $0x30] ss:$12 sps:$4 sm:$0xff]  }
  0x17   :  { %v1570_v24 = vld [vmem:[#allocation2 + $0x1cc] ss:$12 sps:$4 sm:$0xff]   ;;  %v1573_v27 = vld [vmem:[#allocation2 + $0x34] ss:$12 sps:$4 sm:$0xff]   ;;  %v1574_v30 = vld [vmem:[#allocation2 + $0x1b0] ss:$12 sps:$4 sm:$0xff]  }
  0x18   :  { %v1576_v28 = vld [vmem:[#allocation2 + $0x1b4] ss:$12 sps:$4 sm:$0xff]   ;;  %v1579_v31 = vld [vmem:[#allocation2 + $0x1c] ss:$12 sps:$4 sm:$0xff]   ;;  %v1577_v33 = vld [vmem:[#allocation2 + $0x18] ss:$12 sps:$4 sm:$0xff]  }
  0x19   :  { %844 = vmatpush1.bf16.msra.mxu0 %v1547_v12  ;;  %885 = vmatpush1.bf16.msra.mxu1 %v1550_v14  ;;  %v1582_v32 = vld [vmem:[#allocation2 + $0x19c] ss:$12 sps:$4 sm:$0xff]   ;;  %v1580_v34 = vld [vmem:[#allocation2 + $0x198] ss:$12 sps:$4 sm:$0xff]   ;;  %v1583_v37 = vld [vmem:[#allocation2] ss:$12 sps:$4 sm:$0xff]  }
  0x1a   :  { %845 = vmatprep.subr.bf16.mxu0 %v1555_v15  ;;  %886 = vmatprep.subr.bf16.mxu1 %v1558_v16  ;;  %v1585_v35 = vld [vmem:[#allocation2 + $0x4] ss:$12 sps:$4 sm:$0xff]   ;;  %v1586_v38 = vld [vmem:[#allocation2 + $0x180] ss:$12 sps:$4 sm:$0xff]   ;;  %v1589_v41 = vld [vmem:[#allocation2 + $0x168] ss:$12 sps:$4 sm:$0xff]  }
  0x1b   :  { %v1588_v36 = vld [vmem:[#allocation2 + $0x184] ss:$12 sps:$4 sm:$0xff]   ;;  %v1591_v39 = vld [vmem:[#allocation2 + $0x16c] ss:$12 sps:$4 sm:$0xff]   ;;  %v1592_v42 = vld [vmem:[#allocation2 + $0x2e8] ss:$12 sps:$4 sm:$0xff]  }
  0x1c   :  { %v1594_v40 = vld [vmem:[#allocation2 + $0x2ec] ss:$12 sps:$4 sm:$0xff]   ;;  %v1597_v43 = vld [vmem:[#allocation2 + $0x154] ss:$12 sps:$4 sm:$0xff]   ;;  %v1595_v44 = vld [vmem:[#allocation2 + $0x150] ss:$12 sps:$4 sm:$0xff]  }
  0x1d   :  { %846 = vmatpush1.bf16.msra.mxu0 %v1553_v17  ;;  %887 = vmatpush1.bf16.msra.mxu1 %v1556_v18  ;;  %v1600_v45 = vld [vmem:[#allocation2 + $0x2d4] ss:$12 sps:$4 sm:$0xff]   ;;  %v1598_v46 = vld [vmem:[#allocation2 + $0x2d0] ss:$12 sps:$4 sm:$0xff]   ;;  %v1601_v49 = vld [vmem:[#allocation2 + $0x138] ss:$12 sps:$4 sm:$0xff]  }
  0x1e   :  { %847 = vmatprep.subr.bf16.mxu0 %v1561_v19  ;;  %888 = vmatprep.subr.bf16.mxu1 %v1564_v20  ;;  %v1603_v47 = vld [vmem:[#allocation2 + $0x13c] ss:$12 sps:$4 sm:$0xff]   ;;  %v1604_v50 = vld [vmem:[#allocation2 + $0x2b8] ss:$12 sps:$4 sm:$0xff]   ;;  %v1607_v53 = vld [vmem:[#allocation2 + $0x120] ss:$12 sps:$4 sm:$0xff]  }
  0x1f   :  { %v1606_v48 = vld [vmem:[#allocation2 + $0x2bc] ss:$12 sps:$4 sm:$0xff]   ;;  %v1609_v51 = vld [vmem:[#allocation2 + $0x124] ss:$12 sps:$4 sm:$0xff]   ;;  %v1610_v54 = vld [vmem:[#allocation2 + $0x2a0] ss:$12 sps:$4 sm:$0xff]  }
  0x20   :  { %v1612_v52 = vld [vmem:[#allocation2 + $0x2a4] ss:$12 sps:$4 sm:$0xff]   ;;  %v1615_v55 = vld [vmem:[#allocation2 + $0x10c] ss:$12 sps:$4 sm:$0xff]   ;;  %v1613_v57 = vld [vmem:[#allocation2 + $0x108] ss:$12 sps:$4 sm:$0xff]  }
  0x21   :  { %848 = vmatpush1.bf16.msra.mxu0 %v1559_v21  ;;  %889 = vmatpush1.bf16.msra.mxu1 %v1562_v22  ;;  %v1618_v56 = vld [vmem:[#allocation2 + $0x28c] ss:$12 sps:$4 sm:$0xff]   ;;  %v1616_v58 = vld [vmem:[#allocation2 + $0x288] ss:$12 sps:$4 sm:$0xff]   ;;  %v1619_v61 = vld [vmem:[#allocation2 + $0xf0] ss:$12 sps:$4 sm:$0xff]  }
  0x22   :  { %849 = vmatprep.subr.bf16.mxu0 %v1567_v23  ;;  %890 = vmatprep.subr.bf16.mxu1 %v1570_v24  ;;  %v1621_v59 = vld [vmem:[#allocation2 + $0xf4] ss:$12 sps:$4 sm:$0xff]   ;;  %v1622_v62 = vld [vmem:[#allocation2 + $0x270] ss:$12 sps:$4 sm:$0xff]   ;;  %v1625_v2 = vld [vmem:[#allocation2 + $0xd8] ss:$12 sps:$4 sm:$0xff]  }
  0x23   :  { %v1624_v60 = vld [vmem:[#allocation2 + $0x274] ss:$12 sps:$4 sm:$0xff]   ;;  %v1627_v63 = vld [vmem:[#allocation2 + $0xdc] ss:$12 sps:$4 sm:$0xff]   ;;  %v1628_v3 = vld [vmem:[#allocation2 + $0x258] ss:$12 sps:$4 sm:$0xff]  }
  0x24   :  { %v1630_v1 = vld [vmem:[#allocation2 + $0x25c] ss:$12 sps:$4 sm:$0xff]   ;;  %v1633_v4 = vld [vmem:[#allocation2 + $0xc4] ss:$12 sps:$4 sm:$0xff]   ;;  %v1631_v6 = vld [vmem:[#allocation2 + $0xc0] ss:$12 sps:$4 sm:$0xff]  }
  0x25   :  { %850 = vmatpush1.bf16.msra.mxu0 %v1565_v25  ;;  %891 = vmatpush1.bf16.msra.mxu1 %v1568_v26  ;;  %v1636_v5 = vld [vmem:[#allocation2 + $0x244] ss:$12 sps:$4 sm:$0xff]   ;;  %v1634_v7 = vld [vmem:[#allocation2 + $0x240] ss:$12 sps:$4 sm:$0xff]   ;;  %v1806_v11 = vshrl.u32 %v50_v10, 7  ;;  %vm1744_vm1 = vmmov 0  }
  0x26   :  { %851 = vmatprep.subr.bf16.mxu0 %v1573_v27  ;;  %892 = vmatprep.subr.bf16.mxu1 %v1576_v28  ;;  %v1637_v8 = vld [vmem:[#allocation2 + $0x170] ss:$12 sps:$4 sm:$0xff]   ;;  %v48_v14 = vld [vmem:[%s1925_s2] sm:$0xf]  ;;  %s1745_s15 = smov [#allocation5]   ;;  %vm1289_vm2 = vcmask 58368  }
  0x27   :  { %v1638_v9 = vld [vmem:[#allocation2 + $0x2f0] ss:$12 sps:$4 sm:$0xff]   ;;  %v52_v12 = vsub.s32 0, %v1806_v11  ;;  %v60_v13 = vsub.s32 2, %v1806_v11  ;;  %v56_v15 = vsub.s32 1, %v1806_v11  ;;  %v64_v16 = vsub.s32 3, %v1806_v11 }
  0x28   :  { %v1671_v10 = vld [vmem:[%s1928_s5 + $0x70] sm:$0xff]   ;;  %s1297_s16 = sshll.u32 %s1745_s15, 4  ;;  %s1298_s16 = int_to_ptr.vmem [resolvable:$true] %s1297_s16 }
  0x29   :  { %852 = vmatpush1.bf16.msra.mxu0 %v1571_v29  ;;  %893 = vmatpush1.bf16.msra.mxu1 %v1574_v30  ;;  %v53_v17 = vrot.slane %v48_v14, %v52_v12  ;;  %v61_v18 = vrot.slane %v48_v14, %v60_v13  ;;  %v57_v19 = vrot.slane %v48_v14, %v56_v15  ;;  %s1715_s0 = scalar_lea.vmem %s1298_s16, 32  ;;  %p1720_p6 = scmp.lt.s32.totalorder %s1298_s16, %s1298_s16 }
  0x2a   :  { %853 = vmatprep.subr.bf16.mxu0 %v1579_v31  ;;  %894 = vmatprep.subr.bf16.mxu1 %v1582_v32  ;;  %v65_v20 = vrot.slane %v48_v14, %v64_v16  ;;  %v1672_v14 = vld [vmem:[%s1928_s5 + $0x30] sm:$0xff]   ;;  %v1673_v16 = vld [vmem:[%s1928_s5 + $0x68] sm:$0xff]   ;;  %p1716_p5 = scmp.ne.s32.totalorder %s1298_s16, %s1715_s0  ;;  %p1721_p7 = scmp.lt.s32.totalorder %s1715_s0, %s1715_s0 }
  0x2c   :  { %p1722_p8 = por %p1721_p7, %p1720_p6 }
  0x2d   :  { %854 = vmatpush1.bf16.msra.mxu0 %v1577_v33  ;;  %895 = vmatpush1.bf16.msra.mxu1 %v1580_v34 }
  0x2e   :  { %855 = vmatprep.subr.bf16.mxu0 %v1585_v35  ;;  %896 = vmatprep.subr.bf16.mxu1 %v1588_v36  ;;  %p1723_p9 = pnand %p1722_p8, %p1716_p5 }
  0x31   :  { %856 = vmatpush1.bf16.msra.mxu0 %v1583_v37  ;;  %897 = vmatpush1.bf16.msra.mxu1 %v1586_v38 }
  0x32   :  { %857 = vmatprep.subr.bf16.mxu0 %v1591_v39  ;;  %898 = vmatprep.subr.bf16.mxu1 %v1594_v40  ;;  %v1639_v40 = vld [vmem:[#allocation2 + $0xb0] ss:$12 sps:$4 sm:$0xff]  }
  0x35   :  { %858 = vmatpush2.bf16.msra.mxu0 %v1589_v41  ;;  %899 = vmatpush2.bf16.msra.mxu1 %v1592_v42  ;;  %v1640_v41 = vld [vmem:[#allocation2 + $0x230] ss:$12 sps:$4 sm:$0xff]  }
  0x36   :  { %859 = vmatprep.subr.bf16.mxu0 %v1597_v43  ;;  %900 = vmatprep.subr.bf16.mxu1 %v1600_v45  ;;  %v1641_v43 = vld [vmem:[#allocation2 + $0x158] ss:$12 sps:$4 sm:$0xff]  }
  0x37   :  { %v1643_v45 = vld [vmem:[#allocation2 + $0x98] ss:$12 sps:$4 sm:$0xff]  }
  0x39   :  { %860 = vmatpush2.bf16.msra.mxu0 %v1595_v44  ;;  %901 = vmatpush2.bf16.msra.mxu1 %v1598_v46  ;;  %v1642_v44 = vld [vmem:[#allocation2 + $0x2d8] ss:$12 sps:$4 sm:$0xff]  }
  0x3a   :  { %861 = vmatprep.subr.bf16.mxu0 %v1603_v47  ;;  %902 = vmatprep.subr.bf16.mxu1 %v1606_v48  ;;  %v1644_v46 = vld [vmem:[#allocation2 + $0x218] ss:$12 sps:$4 sm:$0xff]   ;;  %v1645_v47 = vld [vmem:[#allocation2 + $0x140] ss:$12 sps:$4 sm:$0xff]  }
  0x3b   :  { %v1646_v48 = vld [vmem:[#allocation2 + $0x2c0] ss:$12 sps:$4 sm:$0xff]  }
  0x3d   :  { %862 = vmatpush2.bf16.msra.mxu0 %v1601_v49  ;;  %903 = vmatpush2.bf16.msra.mxu1 %v1604_v50  ;;  %v1647_v49 = vld [vmem:[#allocation2 + $0x80] ss:$12 sps:$4 sm:$0xff]  }
  0x3e   :  { %863 = vmatprep.subr.bf16.mxu0 %v1609_v51  ;;  %904 = vmatprep.subr.bf16.mxu1 %v1612_v52  ;;  %v1648_v50 = vld [vmem:[#allocation2 + $0x200] ss:$12 sps:$4 sm:$0xff]   ;;  %v1649_v51 = vld [vmem:[#allocation2 + $0x128] ss:$12 sps:$4 sm:$0xff]  }
  0x3f   :  { %v1650_v52 = vld [vmem:[#allocation2 + $0x2a8] ss:$12 sps:$4 sm:$0xff]  }
  0x41   :  { %864 = vmatpush2.bf16.msra.mxu0 %v1607_v53  ;;  %905 = vmatpush2.bf16.msra.mxu1 %v1610_v54  ;;  %v1651_v53 = vld [vmem:[#allocation2 + $0x68] ss:$12 sps:$4 sm:$0xff]  }
  0x42   :  { %865 = vmatprep.subr.bf16.mxu0 %v1615_v55  ;;  %906 = vmatprep.subr.bf16.mxu1 %v1618_v56  ;;  %v1652_v54 = vld [vmem:[#allocation2 + $0x1e8] ss:$12 sps:$4 sm:$0xff]   ;;  %v1653_v55 = vld [vmem:[#allocation2 + $0x110] ss:$12 sps:$4 sm:$0xff]  }
  0x43   :  { %v1654_v56 = vld [vmem:[#allocation2 + $0x290] ss:$12 sps:$4 sm:$0xff]  }
  0x45   :  { %866 = vmatpush2.bf16.msra.mxu0 %v1613_v57  ;;  %907 = vmatpush2.bf16.msra.mxu1 %v1616_v58  ;;  %v1655_v57 = vld [vmem:[#allocation2 + $0x50] ss:$12 sps:$4 sm:$0xff]  }
  0x46   :  { %867 = vmatprep.subr.bf16.mxu0 %v1621_v59  ;;  %908 = vmatprep.subr.bf16.mxu1 %v1624_v60  ;;  %v1656_v58 = vld [vmem:[#allocation2 + $0x1d0] ss:$12 sps:$4 sm:$0xff]   ;;  %v1657_v59 = vld [vmem:[#allocation2 + $0xf8] ss:$12 sps:$4 sm:$0xff]  }
  0x47   :  { %v1658_v60 = vld [vmem:[#allocation2 + $0x278] ss:$12 sps:$4 sm:$0xff]  }
  0x49   :  { %868 = vmatpush2.bf16.msra.mxu0 %v1619_v61  ;;  %909 = vmatpush2.bf16.msra.mxu1 %v1622_v62  ;;  %v1659_v61 = vld [vmem:[#allocation2 + $0x38] ss:$12 sps:$4 sm:$0xff]  }
  0x4a   :  { %869 = vmatprep.subr.bf16.mxu0 %v1627_v63  ;;  %910 = vmatprep.subr.bf16.mxu1 %v1630_v1  ;;  %v1660_v62 = vld [vmem:[#allocation2 + $0x1b8] ss:$12 sps:$4 sm:$0xff]   ;;  %v1661_v63 = vld [vmem:[#allocation2 + $0xe0] ss:$12 sps:$4 sm:$0xff]  }
  0x4b   :  { %v1662_v1 = vld [vmem:[#allocation2 + $0x260] ss:$12 sps:$4 sm:$0xff]  }
  0x4d   :  { %870 = vmatpush2.bf16.msra.mxu0 %v1625_v2  ;;  %911 = vmatpush2.bf16.msra.mxu1 %v1628_v3  ;;  %v1663_v2 = vld [vmem:[#allocation2 + $0x20] ss:$12 sps:$4 sm:$0xff]  }
  0x4e   :  { %871 = vmatprep.subr.bf16.mxu0 %v1633_v4  ;;  %912 = vmatprep.subr.bf16.mxu1 %v1636_v5  ;;  %v1664_v3 = vld [vmem:[#allocation2 + $0x1a0] ss:$12 sps:$4 sm:$0xff]   ;;  %v1665_v4 = vld [vmem:[#allocation2 + $0xc8] ss:$12 sps:$4 sm:$0xff]  }
  0x4f   :  { %v1666_v5 = vld [vmem:[#allocation2 + $0x248] ss:$12 sps:$4 sm:$0xff]  }
  0x51   :  { %872 = vmatpush2.bf16.msra.mxu0 %v1631_v6  ;;  %913 = vmatpush2.bf16.msra.mxu1 %v1634_v7  ;;  %v1667_v6 = vld [vmem:[#allocation2 + $0x8] ss:$12 sps:$4 sm:$0xff]  }
  0x52   :  { %1433 = vmatprep.subr.bf16.mxu0 %v1637_v8  ;;  %1455 = vmatprep.subr.bf16.mxu1 %v1638_v9  ;;  %v1668_v7 = vld [vmem:[#allocation2 + $0x188] ss:$12 sps:$4 sm:$0xff]   ;;  %v1669_v8 = vld [vmem:[%s1928_s5 + $0x78] sm:$0xff]  }
  0x53   :  { %v1670_v9 = vld [vmem:[%s1928_s5 + $0x38] sm:$0xff]  }
  0xd4   :  { %v128_v21 = vpop.f32.mrf.mxu0  ;;  %v169_v22 = vpop.f32.mrf.mxu1 }
  0xd5   :  { %v129_v23 = vadd.f32 %v128_v21, %v53_v17  ;;  %v170_v24 = vadd.f32 %v169_v22, %v61_v18  ;;  %v1674_v17 = vld [vmem:[%s1928_s5 + $0x28] sm:$0xff]   ;;  %v1675_v18 = vld [vmem:[%s1928_s5 + $0x60] sm:$0xff]   ;;  %v1678_v21 = vld [vmem:[%s1928_s5 + $0x18] sm:$0xff]  }
  0xd6   :  { %v130_v25 = vpop.f32.mrf.mxu0  ;;  %v171_v26 = vpop.f32.mrf.mxu1  ;;  %v1679_v22 = vld [vmem:[%s1928_s5 + $0x50] sm:$0xff]  }
  0xd7   :  { %v178_v27 = vpack.c.bf16 %v170_v24, %v170_v24  ;;  %v131_v28 = vadd.f32 %v130_v25, %v57_v19  ;;  %v172_v29 = vadd.f32 %v171_v26, %v65_v20  ;;  %v176_v30 = vpack.c.bf16 %v129_v23, %v129_v23  ;;  %v1676_v19 = vld [vmem:[%s1928_s5 + $0x20] sm:$0xff]   ;;  %v1677_v20 = vld [vmem:[%s1928_s5 + $0x58] sm:$0xff]   ;;  %v1680_v23 = vld [vmem:[%s1928_s5 + $0x10] sm:$0xff]  }
  0xd8   :  { %v132_v31 = vpop.f32.mrf.mxu0  ;;  %v173_v32 = vpop.f32.mrf.mxu1  ;;  %v1681_v24 = vld [vmem:[%s1928_s5 + $0x48] sm:$0xff]   ;;  %v1683_v26 = vld [vmem:[%s1928_s5 + $0x40] sm:$0xff]  }
  0xd9   :  { %v177_v33 = vpack.c.bf16 %v131_v28, %v131_v28  ;;  %v179_v34 = vpack.c.bf16 %v172_v29, %v172_v29  ;;  %v1822_v35 = vmax.bf16 %v1742_v0, %v178_v27  ;;  %v1827_v42 = vmax.bf16 %v1742_v0, %v176_v30  ;;  %v1682_v25 = vld [vmem:[%s1928_s5 + $0x8] sm:$0xff]   ;;  %v1684_v27 = vld [vmem:[%s1928_s5] sm:$0xff]   ;;  %v1685_v28 = vld [vmem:[%s1928_s5 + $0xb8] sm:$0xff]  }
  0xda   :  { %v133_v36 = vpop.f32.mrf.mxu0  ;;  %v174_v37 = vpop.f32.mrf.mxu1  ;;  %v1743_v29 = vmov 0.0   ;;  %v1686_v30 = vld [vmem:[%s1928_s5 + $0xb0] sm:$0xff]   ;;  %v1687_v31 = vld [vmem:[%s1928_s5 + $0xa8] sm:$0xff]   ;;  %v1688_v32 = vld [vmem:[%s1928_s5 + $0xa0] sm:$0xff]  }
  0xdb   :  { %v181_v38 = vmax.bf16 %v1742_v0, %v177_v33  ;;  %v183_v39 = vmax.bf16 %v1742_v0, %v179_v34  ;;  %v1689_v33 = vld [vmem:[%s1928_s5 + $0x98] sm:$0xff]   ;;  %v1690_v34 = vld [vmem:[%s1928_s5 + $0x90] sm:$0xff]   ;;  %v1692_v36 = vld [vmem:[%s1928_s5 + $0x80] sm:$0xff]  }
  0xdc   :  { %v312_v37 = vld [vmem:[%s1927_s4] sm:$0x7] }
  0xdd   :  { %873 = vmatprep.mubr.bf16.mxu0 %v181_v38  ;;  %914 = vmatprep.mubr.bf16.mxu1 %v183_v39 }
  0xde   :  { %874 = vmatmul.mubr.bf16.vlgmr.msra.gmra.mxu0 %v1827_v42  ;;  %915 = vmatmul.mubr.bf16.vlgmr.msra.gmra.mxu1 %v1822_v35 }
  0xdf   :  { %1434 = vmatpush3.bf16.msra.mxu0 %v1639_v40  ;;  %1456 = vmatpush3.bf16.msra.mxu1 %v1640_v41 }
  0xe0   :  { %955 = vmatprep.mubr.bf16.mxu0 %v181_v38  ;;  %995 = vmatprep.mubr.bf16.mxu1 %v183_v39  ;;  %v317_v38 = vrot.slane %v312_v37, %v52_v12  ;;  %v321_v39 = vrot.slane %v312_v37, %v56_v15 }
  0xe1   :  { %1435 = vmatprep.subr.bf16.mxu0 %v1641_v43  ;;  %1457 = vmatprep.subr.bf16.mxu1 %v1642_v44 }
  0xe3   :  { %1436 = vmatpush3.bf16.msra.mxu0 %v1643_v45  ;;  %1458 = vmatpush3.bf16.msra.mxu1 %v1644_v46 }
  0xe4   :  { %1437 = vmatprep.subr.bf16.mxu0 %v1645_v47  ;;  %1459 = vmatprep.subr.bf16.mxu1 %v1646_v48 }
  0xe7   :  { %1438 = vmatpush3.bf16.msra.mxu0 %v1647_v49  ;;  %1460 = vmatpush3.bf16.msra.mxu1 %v1648_v50 }
  0xe8   :  { %1439 = vmatprep.subr.bf16.mxu0 %v1649_v51  ;;  %1461 = vmatprep.subr.bf16.mxu1 %v1650_v52 }
  0xeb   :  { %1440 = vmatpush3.bf16.msra.mxu0 %v1651_v53  ;;  %1462 = vmatpush3.bf16.msra.mxu1 %v1652_v54 }
  0xec   :  { %1441 = vmatprep.subr.bf16.mxu0 %v1653_v55  ;;  %1463 = vmatprep.subr.bf16.mxu1 %v1654_v56  ;;  %v325_v56 = vrot.slane %v312_v37, %v60_v13  ;;  %v1408_v13 = vld [vmem:[%s1929_s6] ss:$0 sm:$0xff] }
  0xef   :  { %1442 = vmatpush3.bf16.msra.mxu0 %v1655_v57  ;;  %1464 = vmatpush3.bf16.msra.mxu1 %v1656_v58 }
  0xf0   :  { %1443 = vmatprep.subr.bf16.mxu0 %v1657_v59  ;;  %1465 = vmatprep.subr.bf16.mxu1 %v1658_v60 }
  0xf3   :  { %1444 = vmatpush3.bf16.msra.mxu0 %v1659_v61  ;;  %1466 = vmatpush3.bf16.msra.mxu1 %v1660_v62 }
  0xf4   :  { %1445 = vmatprep.subr.bf16.mxu0 %v1661_v63  ;;  %1467 = vmatprep.subr.bf16.mxu1 %v1662_v1 }
  0xf7   :  { %1446 = vmatpush3.bf16.msra.mxu0 %v1663_v2  ;;  %1468 = vmatpush3.bf16.msra.mxu1 %v1664_v3 }
  0xf8   :  { %1447 = vmatprep.subr.bf16.mxu0 %v1665_v4  ;;  %1469 = vmatprep.subr.bf16.mxu1 %v1666_v5 }
  0xfb   :  { %1448 = vmatpush3.bf16.msra.mxu0 %v1667_v6  ;;  %1470 = vmatpush3.bf16.msra.mxu1 %v1668_v7 }
  0xfc   :  { %1477 = vmatprep.subr.bf16.mxu0 %v1669_v8  ;;  %1508 = vmatprep.subr.bf16.mxu1 %v1743_v29 }
  0xfe   :  { %956 = vmatmul.mubr.bf16.vlgmr.msra.gmra.mxu0 %v1827_v42  ;;  %996 = vmatmul.mubr.bf16.vlgmr.msra.gmra.mxu1 %v1822_v35  ;;  %v1691_v35 = vld [vmem:[%s1928_s5 + $0x88] sm:$0xff]  }
  0xff   :  { %1478 = vmatpush3.bf16.msra.mxu0 %v1670_v9  ;;  %1509 = vmatpush3.bf16.msra.mxu1 %v1685_v28 }
 0x100   :  { %1479 = vmatprep.subr.bf16.mxu0 %v1671_v10  ;;  %1510 = vmatprep.subr.bf16.mxu1 %v1743_v29 }
 0x101   :  { %1524 = vmatprep.mubr.msk.bf16.mxu1 %vm1744_vm1, %v1743_v29 }
 0x103   :  { %1480 = vmatpush3.bf16.msra.mxu0 %v1672_v14  ;;  %1511 = vmatpush3.bf16.msra.mxu1 %v1686_v30 }
 0x104   :  { %1481 = vmatprep.subr.bf16.mxu0 %v1673_v16  ;;  %1512 = vmatprep.subr.bf16.mxu1 %v1743_v29 }
 0x107   :  { %1482 = vmatpush3.bf16.msra.mxu0 %v1674_v17  ;;  %1513 = vmatpush3.bf16.msra.mxu1 %v1687_v31 }
 0x108   :  { %1483 = vmatprep.subr.bf16.mxu0 %v1675_v18  ;;  %1514 = vmatprep.subr.bf16.mxu1 %v1743_v29 }
 0x10b   :  { %1484 = vmatpush3.bf16.msra.mxu0 %v1676_v19  ;;  %1515 = vmatpush3.bf16.msra.mxu1 %v1688_v32 }
 0x10c   :  { %1485 = vmatprep.subr.bf16.mxu0 %v1677_v20  ;;  %1516 = vmatprep.subr.bf16.mxu1 %v1743_v29 }
 0x10f   :  { %1486 = vmatpush3.bf16.msra.mxu0 %v1678_v21  ;;  %1517 = vmatpush3.bf16.msra.mxu1 %v1689_v33 }
 0x110   :  { %1487 = vmatprep.subr.bf16.mxu0 %v1679_v22  ;;  %1518 = vmatprep.subr.bf16.mxu1 %v1743_v29 }
 0x113   :  { %1488 = vmatpush3.bf16.msra.mxu0 %v1680_v23  ;;  %1519 = vmatpush3.bf16.msra.mxu1 %v1690_v34 }
 0x114   :  { %1489 = vmatprep.subr.bf16.mxu0 %v1681_v24  ;;  %1520 = vmatprep.subr.bf16.mxu1 %v1743_v29 }
 0x117   :  { %1490 = vmatpush3.bf16.msra.mxu0 %v1682_v25  ;;  %1521 = vmatpush3.bf16.msra.mxu1 %v1691_v35 }
 0x118   :  { %1491 = vmatprep.subr.bf16.mxu0 %v1683_v26  ;;  %1522 = vmatprep.subr.bf16.mxu1 %v1743_v29 }
 0x11b   :  { %1492 = vmatpush3.bf16.msra.mxu0 %v1684_v27  ;;  %1523 = vmatpush3.bf16.msra.mxu1 %v1692_v36 }
 0x19e   :  { %v875_v40 = vpop.f32.mrf.mxu0  ;;  %v916_v41 = vpop.f32.mrf.mxu1 }
 0x19f   :  { %v876_v42 = vadd.f32 %v875_v40, %v317_v38 }
 0x1a0   :  { %v877_v43 = vpop.f32.mrf.mxu0  ;;  %v918_v44 = vpop.f32.mrf.mxu1 }
 0x1a1   :  { %v917_v45 = vadd.f32 %v916_v41, %v876_v42  ;;  %v878_v46 = vadd.f32 %v877_v43, %v321_v39 }
 0x1a2   :  { %v879_v47 = vpop.f32.mrf.mxu0  ;;  %v920_v48 = vpop.f32.mrf.mxu1 }
 0x1a3   :  { %v919_v49 = vadd.f32 %v918_v44, %v878_v46  ;;  %v1003_v50 = vpack.c.bf16 %v917_v45, %v917_v45 }
 0x1a4   :  { %v880_v51 = vpop.f32.mrf.mxu0  ;;  %v921_v52 = vpop.f32.mrf.mxu1 }
 0x1a5   :  { %v1004_v53 = vpack.c.bf16 %v919_v49, %v919_v49  ;;  %v1006_v12 = vmax.bf16 %v1742_v0, %v1003_v50 }
 0x1a7   :  { %v1007_v54 = vmax.bf16 %v1742_v0, %v1004_v53 }
 0x1a9   :  { %1240 = vmatprep.mubr.bf16.mxu0 %v1007_v54 }
 0x1aa   :  { %1241 = vmatmul.mubr.bf16.vlgmr.msra.gmra.mxu0 %v1006_v12 }
 0x1be   :  { %v1449_v15 = vpop.f32.mrf.mxu0  ;;  %v1471_v55 = vpop.f32.mrf.mxu1 }
 0x1c0   :  { %v1450_v57 = vpop.f32.mrf.mxu0  ;;  %v1472_v58 = vpop.f32.mrf.mxu1 }
 0x1c1   :  { %v1451_v59 = vadd.f32 %v1450_v57, %v1449_v15  ;;  %v1473_v63 = vadd.f32 %v1472_v58, %v1471_v55 }
 0x1c2   :  { %v1452_v60 = vpop.f32.mrf.mxu0  ;;  %v1474_v61 = vpop.f32.mrf.mxu1 }
 0x1c3   :  { %v958_v62 = vadd.f32 %v1451_v59, %v325_v56 }
 0x1c4   :  { %v1453_v1 = vpop.f32.mrf.mxu0  ;;  %v1475_v2 = vpop.f32.mrf.mxu1 }
 0x1c5   :  { %v998_v3 = vadd.f32 %v1473_v63, %v958_v62 }
 0x1c7   :  { %v1005_v4 = vpack.c.bf16 %v998_v3, %v998_v3 }
 0x1c9   :  { %v1008_v5 = vmax.bf16 %v1742_v0, %v1005_v4 }
 0x1cb   :  { %1525 = vmatmul.mubr.bf16.vlgmr.msra.gmra.mxu1 %v1008_v5 }
 0x26a   :  { %v1493_v6 = vpop.f32.mrf.mxu0 }
 0x26c   :  { %v1494_v7 = vpop.f32.mrf.mxu0 }
 0x26d   :  { %v1495_v11 = vadd.f32 %v1494_v7, %v1493_v6 }
 0x26e   :  { %v1496_v8 = vpop.f32.mrf.mxu0 }
 0x26f   :  { %v1243_v10 = vadd.f32 %v1495_v11, %v1408_v13 }
 0x270   :  { %v1497_v9 = vpop.f32.mrf.mxu0 }
 0x28b   :  { %v1282_v14 = vpop.f32.mrf.mxu1 }
 0x28c   :  { %v1283_v16 = vadd.f32 %v1282_v14, %v1243_v10 }
 0x28d   :  { %v1526_v17 = vpop.f32.mrf.mxu1 }
 0x28e   :  { %1693 = vtanh.f32 %v1283_v16 }
 0x28f   :  { %v1285_v18 = vpop.f32.mrf.mxu1 }
 0x291   :  { %v1527_v19 = vpop.f32.mrf.mxu1 }
 0x29b   :  { %v1694_v0 = vpop.eup %1693 }
 0x29c   :  { %1290 = vst.msk [vmem:[#allocation5] sm:$0x3] %vm1289_vm2, %v1694_v0 }
 0x29d   :  { %1726 = shalt.err (!%p1723_p9)
}
 0x29e   :  { %1300 = dma.vmem_to_hbm [thread:$0]  %s1298_s16, 32, %s1930_s7, [#allocation4]  }
 0x29f   :  { %1737 = dma.done.wait [#allocation4], 32  }
 0x2a0   :  { %1738 = vsyncadd [#allocation4], 4294967264 }
 0x2a1   :  { %1304 = vsyncpa [#allocation3], 1 }
 0x2a2   :  { %1305 = vsyncpa [#allocation4], 1 }

</bundles_post_ra>
